<compile_context>
chip_gen: v7x
topology: tpu7x:2x2x1
jax: 0.10.0
libtpu: 0.0.40
codegen_flags: <defaults>
</compile_context>

<pallas_src>
import functools

import jax
import jax.numpy as jnp
from jax.experimental import pallas as pl
from jax.experimental.pallas import tpu as pltpu

LANES = 128
MAX_TILE_ROWS = 1024   # (1024, 128) f32 block = 512 KiB per input; 2 MiB double-buffered
NCORES = 2             # shard the row axis across TensorCores (no-op on 1-TC chips)


def _round_up(v, m):
    return -(-v // m) * m


def _bce_dice_partial_kernel(x_ref, y_ref, o_ref, *, tile_rows):
    """Accumulates per-core partial sums into o_ref of shape (1, 4, 8, LANES):
       slots [xy, xx, yy, bce], each an (8, LANES) vreg-shaped partial."""
    s = pl.program_id(1)

    @pl.when(s == 0)
    def _init():
        o_ref[...] = jnp.zeros_like(o_ref)

    x = x_ref[...].astype(jnp.float32)
    y = y_ref[...].astype(jnp.float32)

    # torch.nn.functional.binary_cross_entropy clamps each log term at -100.
    # Rewritten as y*(log_x - log_1mx) + log_1mx to save a multiply per element.
    log_x = jnp.maximum(jnp.log(x), -100.0)
    log_1mx = jnp.maximum(jnp.log(1.0 - x), -100.0)
    bce_el = -(y * (log_x - log_1mx) + log_1mx)

    r = tile_rows // 8

    def vreg_partial(v):
        # (tile_rows, LANES) -> (r, 8, LANES), reduce the leading (vreg) axis:
        # pure VPU adds; the cross-sublane/lane reduce happens once, outside.
        return jnp.sum(v.reshape(r, 8, LANES), axis=0)

    o_ref[0, 0] += vreg_partial(x * y)
    o_ref[0, 1] += vreg_partial(x * x)
    o_ref[0, 2] += vreg_partial(y * y)
    o_ref[0, 3] += vreg_partial(bce_el)


def bce_dice_loss(x, y, bce_rate=0.5):
    """Pallas equivalent of Bce_Diceloss(bce_rate)(x, y); returns an f32 scalar."""
    assert x.shape == y.shape
    total = x.size

    rows = -(-total // LANES)
    rows_per_core = -(-rows // NCORES)
    # multiple of 16 keeps the block legal for both f32 (8,128) and bf16 (16,128)
    tile_rows = min(MAX_TILE_ROWS, _round_up(max(rows_per_core, 1), 16))
    steps_per_core = -(-rows_per_core // tile_rows)
    padded_rows = NCORES * steps_per_core * tile_rows
    padded_total = padded_rows * LANES

    # Flatten and pad in the NATIVE dtype (no wrapper-side f32 upcast; the cast
    # happens in-kernel).  x=0, y=0 padding contributes 0 to every partial sum.
    xf = x.reshape(-1)
    yf = y.reshape(-1)
    pad = padded_total - total
    if pad:
        xf = jnp.pad(xf, (0, pad))
        yf = jnp.pad(yf, (0, pad))
    x2 = xf.reshape(padded_rows, LANES)
    y2 = yf.reshape(padded_rows, LANES)

    kernel = functools.partial(_bce_dice_partial_kernel, tile_rows=tile_rows)

    partials = pl.pallas_call(
        kernel,
        out_shape=jax.ShapeDtypeStruct((NCORES, 4, 8, LANES), jnp.float32),
        grid_spec=pltpu.PrefetchScalarGridSpec(
            num_scalar_prefetch=0,
            grid=(NCORES, steps_per_core),
            in_specs=[
                pl.BlockSpec((tile_rows, LANES),
                             lambda c, s: (c * steps_per_core + s, 0)),
                pl.BlockSpec((tile_rows, LANES),
                             lambda c, s: (c * steps_per_core + s, 0)),
            ],
            out_specs=pl.BlockSpec((1, 4, 8, LANES),
                                   lambda c, s: (c, 0, 0, 0)),
        ),
        compiler_params=pltpu.CompilerParams(
            dimension_semantics=("parallel", "arbitrary")),
    )(x2, y2)

    # Tiny final reduce + scalar combine in plain JAX (2*4*8*128 elements).
    sums = jnp.sum(partials, axis=(0, 2, 3))  # (4,)
    sxy, sxx, syy, sbce = sums[0], sums[1], sums[2], sums[3]
    eps = jnp.float32(0.0001)
    rate = jnp.float32(bce_rate)
    dice = (2.0 * sxy + eps) / (sxx + syy + eps)
    bce_mean = sbce / jnp.float32(total)
    return (1.0 - dice) * (1.0 - rate) + rate * bce_mean


def _reference(x, y, bce_rate=0.5):
    xf = x.astype(jnp.float32).ravel()
    yf = y.astype(jnp.float32).ravel()
    eps = 0.0001
    dice = (2.0 * jnp.sum(xf * yf) + eps) / (jnp.sum(xf * xf) + jnp.sum(yf * yf) + eps)
    bce = jnp.mean(-(yf * jnp.maximum(jnp.log(xf), -100.0)
                     + (1.0 - yf) * jnp.maximum(jnp.log(1.0 - xf), -100.0)))
    return (1.0 - dice) * (1.0 - bce_rate) + bce_rate * bce


if __name__ == "__main__":
    key = jax.random.PRNGKey(0)
    kx, ky = jax.random.split(key)
    # x: predicted probabilities in (0,1); y: binary targets — NCHW like the module expects.
    x = jax.nn.sigmoid(jax.random.normal(kx, (2, 4, 16, 16), dtype=jnp.float32))
    y = jax.random.bernoulli(ky, 0.5, (2, 4, 16, 16)).astype(jnp.float32)

    loss = jax.block_until_ready(bce_dice_loss(x, y, bce_rate=0.5))
    ref = jax.block_until_ready(_reference(x, y, bce_rate=0.5))
    assert jnp.allclose(loss, ref, rtol=1e-5, atol=1e-5), (loss, ref)
    print("KERNEL_OK")
</pallas_src>

<mosaic_0001>
module attributes {stable_mosaic.version = 11 : i64} {
  func.func @_bce_dice_partial_kernel(%arg0: i32, %arg1: i32, %arg2: memref<16x128xf32, #tpu.memory_space<vmem>>, %arg3: memref<16x128xf32, #tpu.memory_space<vmem>>, %arg4: memref<1x4x8x128xf32, #tpu.memory_space<vmem>>) attributes {dimension_semantics = [#tpu.dimension_semantics<parallel>, #tpu.dimension_semantics<arbitrary>], iteration_bounds = array<i64: 2, 1>, scalar_prefetch = 0 : i64, scratch_operands = 0 : i64, tpu.core_type = #tpu.core_type<tc>, window_params = [{transform_indices = @transform_0, window_bounds = array<i64: 16, 128>}, {transform_indices = @transform_1, window_bounds = array<i64: 16, 128>}, {transform_indices = @transform_2, window_bounds = array<i64: 1, 4, 8, 128>}]} {
    %c0_i32 = arith.constant 0 : i32
    %0 = arith.cmpi eq, %arg1, %c0_i32 : i32
    %1 = arith.extui %0 : i1 to i32
    %c0_i32_0 = arith.constant 0 : i32
    %2 = arith.cmpi ne, %1, %c0_i32_0 : i32
    scf.if %2 {
      %cst_40 = arith.constant 0.000000e+00 : f32
      %53 = vector.broadcast %cst_40 : f32 to vector<1x4x8x128xf32>
      %c0_41 = arith.constant 0 : index
      %c0_42 = arith.constant 0 : index
      %c0_43 = arith.constant 0 : index
      %c0_44 = arith.constant 0 : index
      %54 = vector.load %arg4[%c0_41, %c0_42, %c0_43, %c0_44] : memref<1x4x8x128xf32, #tpu.memory_space<vmem>>, vector<1x4x8x128xf32>
      tpu.vector_store %arg4[%c0_41, %c0_42, %c0_43, %c0_44], %53 {strides = array<i32>} : memref<1x4x8x128xf32, #tpu.memory_space<vmem>>, vector<1x4x8x128xf32>,
    } else {
    }
    %c0 = arith.constant 0 : index
    %c0_1 = arith.constant 0 : index
    %3 = vector.load %arg2[%c0, %c0_1] : memref<16x128xf32, #tpu.memory_space<vmem>>, vector<16x128xf32>
    %c0_2 = arith.constant 0 : index
    %c0_3 = arith.constant 0 : index
    %4 = vector.load %arg3[%c0_2, %c0_3] : memref<16x128xf32, #tpu.memory_space<vmem>>, vector<16x128xf32>
    %5 = math.log %3 : vector<16x128xf32>
    %cst = arith.constant -1.000000e+02 : f32
    %6 = vector.broadcast %cst : f32 to vector<16x128xf32>
    %7 = arith.maximumf %5, %6 : vector<16x128xf32>
    %cst_4 = arith.constant 1.000000e+00 : f32
    %8 = vector.broadcast %cst_4 : f32 to vector<16x128xf32>
    %9 = arith.subf %8, %3 : vector<16x128xf32>
    %10 = math.log %9 : vector<16x128xf32>
    %cst_5 = arith.constant -1.000000e+02 : f32
    %11 = vector.broadcast %cst_5 : f32 to vector<16x128xf32>
    %12 = arith.maximumf %10, %11 : vector<16x128xf32>
    %13 = arith.subf %7, %12 : vector<16x128xf32>
    %14 = arith.mulf %4, %13 : vector<16x128xf32>
    %15 = arith.addf %14, %12 : vector<16x128xf32>
    %cst_6 = arith.constant 0.000000e+00 : f32
    %16 = vector.broadcast %cst_6 : f32 to vector<16x128xf32>
    %17 = arith.subf %16, %15 : vector<16x128xf32>
    %c0_7 = arith.constant 0 : index
    %c0_8 = arith.constant 0 : index
    %c0_9 = arith.constant 0 : index
    %c0_10 = arith.constant 0 : index
    %18 = vector.load %arg4[%c0_7, %c0_8, %c0_9, %c0_10] : memref<1x4x8x128xf32, #tpu.memory_space<vmem>>, vector<1x1x8x128xf32>
    %19 = vector.shape_cast %18 : vector<1x1x8x128xf32> to vector<8x128xf32>
    %20 = arith.mulf %3, %4 : vector<16x128xf32>
    %21 = vector.shape_cast %20 : vector<16x128xf32> to vector<2x8x128xf32>
    %cst_11 = arith.constant dense<0.000000e+00> : vector<8x128xf32>
    %22 = vector.multi_reduction <add>, %21, %cst_11 [0] : vector<2x8x128xf32> to vector<8x128xf32>
    %23 = arith.addf %19, %22 : vector<8x128xf32>
    %c0_12 = arith.constant 0 : index
    %c0_13 = arith.constant 0 : index
    %c0_14 = arith.constant 0 : index
    %c0_15 = arith.constant 0 : index
    %24 = vector.load %arg4[%c0_12, %c0_13, %c0_14, %c0_15] : memref<1x4x8x128xf32, #tpu.memory_space<vmem>>, vector<1x1x8x128xf32>
    %25 = vector.shape_cast %24 : vector<1x1x8x128xf32> to vector<8x128xf32>
    %26 = vector.shape_cast %23 : vector<8x128xf32> to vector<1x1x8x128xf32>
    tpu.vector_store %arg4[%c0_12, %c0_13, %c0_14, %c0_15], %26 {strides = array<i32>} : memref<1x4x8x128xf32, #tpu.memory_space<vmem>>, vector<1x1x8x128xf32>,
    %c0_16 = arith.constant 0 : index
    %c1 = arith.constant 1 : index
    %c0_17 = arith.constant 0 : index
    %c0_18 = arith.constant 0 : index
    %27 = vector.load %arg4[%c0_16, %c1, %c0_17, %c0_18] : memref<1x4x8x128xf32, #tpu.memory_space<vmem>>, vector<1x1x8x128xf32>
    %28 = vector.shape_cast %27 : vector<1x1x8x128xf32> to vector<8x128xf32>
    %29 = arith.mulf %3, %3 : vector<16x128xf32>
    %30 = vector.shape_cast %29 : vector<16x128xf32> to vector<2x8x128xf32>
    %cst_19 = arith.constant dense<0.000000e+00> : vector<8x128xf32>
    %31 = vector.multi_reduction <add>, %30, %cst_19 [0] : vector<2x8x128xf32> to vector<8x128xf32>
    %32 = arith.addf %28, %31 : vector<8x128xf32>
    %c0_20 = arith.constant 0 : index
    %c1_21 = arith.constant 1 : index
    %c0_22 = arith.constant 0 : index
    %c0_23 = arith.constant 0 : index
    %33 = vector.load %arg4[%c0_20, %c1_21, %c0_22, %c0_23] : memref<1x4x8x128xf32, #tpu.memory_space<vmem>>, vector<1x1x8x128xf32>
    %34 = vector.shape_cast %33 : vector<1x1x8x128xf32> to vector<8x128xf32>
    %35 = vector.shape_cast %32 : vector<8x128xf32> to vector<1x1x8x128xf32>
    tpu.vector_store %arg4[%c0_20, %c1_21, %c0_22, %c0_23], %35 {strides = array<i32>} : memref<1x4x8x128xf32, #tpu.memory_space<vmem>>, vector<1x1x8x128xf32>,
    %c0_24 = arith.constant 0 : index
    %c2 = arith.constant 2 : index
    %c0_25 = arith.constant 0 : index
    %c0_26 = arith.constant 0 : index
    %36 = vector.load %arg4[%c0_24, %c2, %c0_25, %c0_26] : memref<1x4x8x128xf32, #tpu.memory_space<vmem>>, vector<1x1x8x128xf32>
    %37 = vector.shape_cast %36 : vector<1x1x8x128xf32> to vector<8x128xf32>
    %38 = arith.mulf %4, %4 : vector<16x128xf32>
    %39 = vector.shape_cast %38 : vector<16x128xf32> to vector<2x8x128xf32>
    %cst_27 = arith.constant dense<0.000000e+00> : vector<8x128xf32>
    %40 = vector.multi_reduction <add>, %39, %cst_27 [0] : vector<2x8x128xf32> to vector<8x128xf32>
    %41 = arith.addf %37, %40 : vector<8x128xf32>
    %c0_28 = arith.constant 0 : index
    %c2_29 = arith.constant 2 : index
    %c0_30 = arith.constant 0 : index
    %c0_31 = arith.constant 0 : index
    %42 = vector.load %arg4[%c0_28, %c2_29, %c0_30, %c0_31] : memref<1x4x8x128xf32, #tpu.memory_space<vmem>>, vector<1x1x8x128xf32>
    %43 = vector.shape_cast %42 : vector<1x1x8x128xf32> to vector<8x128xf32>
    %44 = vector.shape_cast %41 : vector<8x128xf32> to vector<1x1x8x128xf32>
    tpu.vector_store %arg4[%c0_28, %c2_29, %c0_30, %c0_31], %44 {strides = array<i32>} : memref<1x4x8x128xf32, #tpu.memory_space<vmem>>, vector<1x1x8x128xf32>,
    %c0_32 = arith.constant 0 : index
    %c3 = arith.constant 3 : index
    %c0_33 = arith.constant 0 : index
    %c0_34 = arith.constant 0 : index
    %45 = vector.load %arg4[%c0_32, %c3, %c0_33, %c0_34] : memref<1x4x8x128xf32, #tpu.memory_space<vmem>>, vector<1x1x8x128xf32>
    %46 = vector.shape_cast %45 : vector<1x1x8x128xf32> to vector<8x128xf32>
    %47 = vector.shape_cast %17 : vector<16x128xf32> to vector<2x8x128xf32>
    %cst_35 = arith.constant dense<0.000000e+00> : vector<8x128xf32>
    %48 = vector.multi_reduction <add>, %47, %cst_35 [0] : vector<2x8x128xf32> to vector<8x128xf32>
    %49 = arith.addf %46, %48 : vector<8x128xf32>
    %c0_36 = arith.constant 0 : index
    %c3_37 = arith.constant 3 : index
    %c0_38 = arith.constant 0 : index
    %c0_39 = arith.constant 0 : index
    %50 = vector.load %arg4[%c0_36, %c3_37, %c0_38, %c0_39] : memref<1x4x8x128xf32, #tpu.memory_space<vmem>>, vector<1x1x8x128xf32>
    %51 = vector.shape_cast %50 : vector<1x1x8x128xf32> to vector<8x128xf32>
    %52 = vector.shape_cast %49 : vector<8x128xf32> to vector<1x1x8x128xf32>
    tpu.vector_store %arg4[%c0_36, %c3_37, %c0_38, %c0_39], %52 {strides = array<i32>} : memref<1x4x8x128xf32, #tpu.memory_space<vmem>>, vector<1x1x8x128xf32>,
    return
  }
  func.func @transform_0(%arg0: i32, %arg1: i32) -> (i32, i32) {
    %c1_i32 = arith.constant 1 : i32
    %0 = arith.muli %arg0, %c1_i32 : i32
    %1 = arith.addi %0, %arg1 : i32
    %c0_i32 = arith.constant 0 : i32
    %c0_i32_0 = arith.constant 0 : i32
    return %1, %c0_i32 : i32, i32
  }
  func.func @transform_1(%arg0: i32, %arg1: i32) -> (i32, i32) {
    %c1_i32 = arith.constant 1 : i32
    %0 = arith.muli %arg0, %c1_i32 : i32
    %1 = arith.addi %0, %arg1 : i32
    %c0_i32 = arith.constant 0 : i32
    %c0_i32_0 = arith.constant 0 : i32
    return %1, %c0_i32 : i32, i32
  }
  func.func @transform_2(%arg0: i32, %arg1: i32) -> (i32, i32, i32, i32) {
    %c0_i32 = arith.constant 0 : i32
    %c0_i32_0 = arith.constant 0 : i32
    %c0_i32_1 = arith.constant 0 : i32
    %c0_i32_2 = arith.constant 0 : i32
    return %arg0, %c0_i32, %c0_i32_0, %c0_i32_1 : i32, i32, i32, i32
  }
}

</mosaic_0001>

<bundles_post_ra>
// kernel: tpu_custom_call.1
= control target key start
LH: loop header
LB: loop body
LE: loop exit
PB: predicated region body
PF: predicated region fallthrough
CT: control target
= control target key end

     0   :  { %7 = vsyncpa [#allocation3], 0  ;;  %s918_s0 = inlined_call_operand.hbm [shape: f32[32,128], index: 0, kind: input, shape index: {}]   ;;  %s919_s1 = inlined_call_operand.hbm [shape: f32[32,128], index: 1, kind: input, shape index: {}]   ;;  %s920_s2 = inlined_call_operand.hbm [shape: f32[2,4,8,128], index: 2, kind: output, shape index: {}]  }
   0x1   :  { %9 = vsyncpa [#allocation3 + $0x1], 0 }
   0x2   :  { %10 = vsyncpa [#allocation6], 0 }
   0x3   :  { %12 = vsyncpa [#allocation6 + $0x1], 0 }
   0x4   :  { %13 = vsyncpa [#allocation4], 0 }
   0x5   :  { %15 = vsyncpa [#allocation4 + $0x1], 0  ;;  %s681_s9 = smov 0   ;;  %s683_s10 = smov 0  }
   0x6   :  { %s685_s11 = smov 0   ;;  %s687_s12 = smov 0  }
   0x7   :  { %s689_s13 = smov 0   ;;  %s691_s14 = smov 0  }
   0x8 LB: > { %s403_s15 = sadd.s32 4294967295, %s657_s14   ;;  %s404_s16 = sadd.s32 4294967294, %s657_s14   ;;  %s657_s14 = sphi %s691_s14, %s21_s14   ;;  %s653_s13 = sphi %s689_s13, %s938_s13   ;;  %s649_s12 = sphi %s687_s12, %s937_s12   ;;  %s645_s11 = sphi %s685_s11, %s936_s11   ;;  %s641_s10 = sphi %s683_s10, %s935_s10   ;;  %s637_s9 = sphi %s681_s9, %s934_s9  }
   0x9   : > { %s33_s17 = sadd.s32 1, %s653_s13  ;;  %s42_s18 = sadd.s32 1, %s645_s11 }
   0xa   : > { %p35_p0 = scmp.ge.s32.totalorder %s33_s17, 2  ;;  %p49_p1 = scmp.ne.s32.totalorder %s645_s11, %s641_s10 }
   0xb   : > { %p50_p2 = scmp.eq.s32.totalorder %s657_s14, 0  ;;  %p55_p3 = scmp.ne.s32.totalorder %s641_s10, %s637_s9 }
   0xc   : > { %s940_s17 = smov (%p35_p0, %s33_s17), 0  ;;  %p56_p5 = scmp.eq.s32.totalorder %s403_s15, 0 }
   0xd   : > { %p722_p4 = por %p50_p2, %p49_p1  ;;  %s39_s20 = ssub.s32 %s653_s13, %s940_s17 }
   0xe   : > { %p107_p6 = scmp.eq.s32.totalorder %s403_s15, 1  ;;  %p40_p7 = scmp.eq.s32.totalorder %s39_s20, 0 }
   0xf   : > { %p728_p8 = por %p56_p5, %p55_p3  ;;  %p113_p10 = scmp.eq.s32.totalorder %s404_s16, 1 }
  0x10   : > { %p732_p9 = por %p107_p6, %p49_p1  ;;  %p448_p13 = scmp.lt.s32.totalorder %s657_s14, 2 }
  0x11   : > { %s924_s21 = scalar_select %p728_p8, 1, 0 }
  0x12   : > { %s925_s22 = scalar_select %p732_p9, 1, 0 }
  0x13   : > { %s737_s23 = scalar_select %p40_p7, %s645_s11, %s42_s18  }
  0x14   : > { %p739_p11 = por %p113_p10, %p55_p3  ;;  %s746_s25 = sand.u32 1, %s645_s11  }
  0x15   : > { %s407_s26 = sshll.u32 %s746_s25, 4  ;;  %s428_s27 = sshll.u32 %s653_s13, 8 }
  0x16   : > { %s926_s24 = scalar_select %p739_p11, 1, 0 }
  0x17   : > { %s755_s30 = scalar_lea.hbm %s918_s0, %s428_s27  ;;  %s137_s3 = scalar_lea.vmem [#allocation2], %s407_s26 }
  0x18   : > { %s145_s4 = sshll.u32 %s137_s3, 4  ;;  %p763_p0 = pnand %p448_p13, %p722_p4  ;;  %s759_s4 = int_to_ptr.vmem [resolvable:$true] %s145_s4 }
  0x19   : > { %s134_s6 = scalar_lea.sflag [#allocation3], %s746_s25  ;;  %s511_s7 = scalar_lea.hbm %s755_s30, 256 }
  0x1a   : > { %p512_p2 = scmp.ne.s32.totalorder %s755_s30, %s511_s7  ;;  %p513_p3 = pneg %p763_p0 }
  0x1b   : > { %s516_s16 = scalar_lea.hbm %s918_s0, 512  ;;  %p517_p4 = scmp.lt.u32.totalorder %s755_s30, %s918_s0 }
  0x1c   : > { %p514_p5 = pnand %p513_p3, %p512_p2  ;;  %p518_p7 = scmp.lt.u32.totalorder %s516_s16, %s511_s7 }
  0x1d   : > { %p520_p13 = scmp.lt.u32.totalorder %s511_s7, %s755_s30 }
  0x1e   : > { %p515_p6 = pneg %p514_p5  ;;  %p519_p10 = por %p518_p7, %p517_p4 }
  0x20   : > { %p521_p12 = por %p520_p13, %p519_p10 }
  0x22   : > { %p522_p1 = pnand %p521_p12, %p515_p6 }
  0x24   : > { %525 = shalt.err (!%p522_p1)
}
  0x25   : > { %s526_s20 = scalar_lea.vmem %s759_s4, 256  ;;  %s659_s28 = smov [#allocation2]  }
  0x26   : > { %p527_p2 = scmp.ne.s32.totalorder %s759_s4, %s526_s20  ;;  %s531_s29 = sshll.u32 %s659_s28, 4  ;;  %s532_s29 = int_to_ptr.vmem [resolvable:$false] %s531_s29 }
  0x27   : > { %s533_s3 = scalar_lea.vmem %s532_s29, 512  ;;  %p534_p9 = scmp.lt.s32.totalorder %s759_s4, %s532_s29 }
  0x28   : > { %p529_p5 = pnand %p527_p2, %p513_p3  ;;  %p535_p4 = scmp.lt.s32.totalorder %s533_s3, %s526_s20 }
  0x2a   : > { %p530_p11 = pneg %p529_p5  ;;  %p536_p7 = por %p535_p4, %p534_p9 }
  0x2c   : > { %p537_p10 = pnand %p536_p7, %p530_p11 }
  0x2e   : > { %540 = shalt.err (!%p537_p10)
}
  0x2f   : > { %s660_s7 = smov 128   ;;  %s661_s8 = smov 8  }
  0x30   : > { %440 = dma.hbm_to_vmem [thread:$0]  (!%p763_p0), %s755_s30, 256, %s759_s4, %s134_s6, %s660_s7, %s660_s7, %s661_s8  }
  0x31   : > { %p175_p9 = scmp.lt.s32.totalorder %s657_s14, 3  ;;  %s805_s18 = scalar_lea.hbm %s919_s1, %s428_s27 }
  0x32   : > { %p928_p11 = scmp.ge.s32.totalorder %s657_s14, 1  ;;  %s159_s20 = scalar_lea.vmem [#allocation5], %s407_s26 }
  0x33   : > { %s167_s28 = sshll.u32 %s159_s20, 4  ;;  %s156_s30 = scalar_lea.sflag [#allocation6], %s746_s25  ;;  %s815_s28 = int_to_ptr.vmem [resolvable:$true] %s167_s28 }
  0x34   : > { %p809_p12 = pnand %p928_p11, %p175_p9  ;;  %s541_s4 = scalar_lea.hbm %s805_s18, 256 }
  0x35   : > { %p542_p1 = scmp.ne.s32.totalorder %s805_s18, %s541_s4  ;;  %s546_s29 = scalar_lea.hbm %s919_s1, 512 }
  0x36   : > { %p547_p2 = scmp.lt.u32.totalorder %s805_s18, %s919_s1  ;;  %p548_p5 = scmp.lt.u32.totalorder %s546_s29, %s541_s4 }
  0x37   : > { %p544_p6 = pnand %p542_p1, %p513_p3  ;;  %p550_p7 = scmp.lt.u32.totalorder %s541_s4, %s805_s18 }
  0x38   : > { %p549_p4 = por %p548_p5, %p547_p2 }
  0x39   : > { %p545_p13 = pneg %p544_p6 }
  0x3a   : > { %p551_p10 = por %p550_p7, %p549_p4 }
  0x3c   : > { %p552_p9 = pnand %p551_p10, %p545_p13 }
  0x3e   : > { %555 = shalt.err (!%p552_p9)
}
  0x3f   : > { %s556_s26 = scalar_lea.vmem %s815_s28, 256  ;;  %s662_s16 = smov [#allocation5]  }
  0x40   : > { %p557_p11 = scmp.ne.s32.totalorder %s815_s28, %s556_s26  ;;  %s561_s20 = sshll.u32 %s662_s16, 4  ;;  %s562_s20 = int_to_ptr.vmem [resolvable:$false] %s561_s20 }
  0x41   : > { %s563_s27 = scalar_lea.vmem %s562_s20, 512  ;;  %p564_p8 = scmp.lt.s32.totalorder %s815_s28, %s562_s20 }
  0x42   : > { %p559_p1 = pnand %p557_p11, %p513_p3  ;;  %p565_p2 = scmp.lt.s32.totalorder %s563_s27, %s556_s26 }
  0x44   : > { %p560_p6 = pneg %p559_p1  ;;  %p566_p5 = por %p565_p2, %p564_p8 }
  0x46   : > { %p567_p4 = pnand %p566_p5, %p560_p6 }
  0x48   : > { %570 = shalt.err (!%p567_p4)
}
  0x49   : > { %443 = dma.hbm_to_vmem [thread:$0]  (!%p763_p0), %s805_s18, 256, %s815_s28, %s156_s30, %s660_s7, %s660_s7, %s661_s8  }
  0x4a   : > { %179 = sbr.rel (%p809_p12) target bundleno = 129 (0x81), region = 28  ;;  %s849_s4 = sand.u32 (!%p809_p12), 1, %s641_s10  }
  0x4b   : > { %s414_s6 = sshll.u32 (!%p809_p12), %s849_s4, 4  ;;  %s182_s29 = scalar_lea.sflag (!%p809_p12), [#allocation3], %s849_s4 }
  0x4c   : > { %s185_s5 = scalar_lea.vmem (!%p809_p12), [#allocation2], %s414_s6  ;;  %p930_p8 = scmp.ne.s32.totalorder (!%p809_p12), %s924_s21, 0 }
  0x51   : > { %624 = dma.done.wait (%p930_p8), %s182_s29, 256  }
  0x52   : > { %626 = vsyncadd (%p930_p8), %s182_s29, 4294967040  ;;  %s191_s25 = scalar_lea.sflag [#allocation6], %s849_s4  ;;  %s194_s7 = scalar_lea.vmem [#allocation5], %s414_s6 }
  0x53   : > { %628 = dma.done.wait (%p930_p8), %s191_s25, 256  }
  0x54   : > { %630 = vsyncadd (%p930_p8), %s191_s25, 4294967040  ;;  %v232_v0 = vld [vmem:[%s185_s5] sm:$0xff]  ;;  %v233_v1 = vld [vmem:[%s185_s5 + $0x8] sm:$0xff]  ;;  %s416_s8 = sshll.u32 %s849_s4, 5  ;;  %s430_s18 = sshll.u32 %s649_s12, 9 }
  0x55   : > { %v234_v2 = vld [vmem:[%s194_s7] sm:$0xff]  ;;  %v235_v3 = vld [vmem:[%s194_s7 + $0x8] sm:$0xff]  ;;  %503 = vlog2.f32 %v232_v0  ;;  %v266_v5 = vmul.f32 %v232_v0, %v232_v0  ;;  %v267_v6 = vmul.f32 %v233_v1, %v233_v1  ;;  %v242_v11 = vsub.f32 1.0, %v232_v0  ;;  %s219_s21 = scalar_lea.vmem [#allocation7], %s416_s8  ;;  %s867_s3 = scalar_lea.hbm %s920_s2, %s430_s18 }
  0x56   : > { %v259_v4 = vmul.f32 %v234_v2, %v232_v0  ;;  %505 = vlog2.f32 %v233_v1  ;;  %v260_v7 = vmul.f32 %v235_v3, %v233_v1  ;;  %v273_v8 = vmul.f32 %v234_v2, %v234_v2  ;;  %s297_s19 = sshll.u32 %s219_s21, 4  ;;  %s284_s15 = scalar_lea.sflag [#allocation4], %s849_s4  ;;  %s869_s19 = int_to_ptr.vmem [resolvable:$true] %s297_s19 }
  0x57   : > { %v274_v9 = vmul.f32 %v235_v3, %v235_v3  ;;  %v268_v10 = vadd.f32 %v267_v6, %v266_v5  ;;  %v243_v12 = vsub.f32 1.0, %v233_v1  ;;  %507 = vlog2.f32 %v242_v11  ;;  %s571_s26 = scalar_lea.vmem %s869_s19, 512  ;;  %p931_p3 = scmp.ne.s32.totalorder %s925_s22, 0 }
  0x58   : > { %v261_v13 = vadd.f32 %v260_v7, %v259_v4  ;;  %p572_p0 = scmp.ne.s32.totalorder %s869_s19, %s571_s26  ;;  %s663_s12 = smov [#allocation7]  }
  0x59   : > { %v275_v14 = vadd.f32 %v274_v9, %v273_v8  ;;  %509 = vlog2.f32 %v243_v12  ;;  %418 = vst [vmem:[%s219_s21 + $0x8] sm:$0xff] %v268_v10  ;;  %s575_s16 = sshll.u32 %s663_s12, 4  ;;  %s576_s16 = int_to_ptr.vmem [resolvable:$false] %s575_s16 }
  0x5a   : > { %263 = vst [vmem:[%s219_s21] sm:$0xff] %v261_v13  ;;  %p573_p12 = pnand %p572_p0, %p931_p3  ;;  %s577_s20 = scalar_lea.vmem %s576_s16, 1024 }
  0x5b   : > { %420 = vst [vmem:[%s219_s21 + $0x10] sm:$0xff] %v275_v14  ;;  %p578_p7 = scmp.lt.s32.totalorder %s869_s19, %s576_s16  ;;  %p579_p10 = scmp.lt.s32.totalorder %s577_s20, %s571_s26 }
  0x5c   : > { %p574_p13 = pneg %p573_p12 }
  0x5d   : > { %p580_p9 = por %p579_p10, %p578_p7 }
  0x5f   : > { %v504_v15 = vpop.eup %503  ;;  %p581_p11 = pnand %p580_p9, %p574_p13 }
  0x60   : > { %v506_v16 = vpop.eup %505  ;;  %v237_v17 = vmul.f32 0.6931472, %v504_v15 }
  0x61   : > { %v239_v18 = vmul.f32 0.6931472, %v506_v16  ;;  %v508_v19 = vpop.eup %507 }
  0x62   : > { %v240_v21 = vmax.f32 %v237_v17, -100.0  ;;  %v245_v22 = vmul.f32 0.6931472, %v508_v19 }
  0x63   : > { %v510_v20 = vpop.eup %509  ;;  %v241_v23 = vmax.f32 %v239_v18, -100.0 }
  0x64   : > { %v247_v24 = vmul.f32 0.6931472, %v510_v20  ;;  %v248_v25 = vmax.f32 %v245_v22, -100.0 }
  0x66   : > { %v249_v26 = vmax.f32 %v247_v24, -100.0  ;;  %v250_v27 = vsub.f32 %v240_v21, %v248_v25 }
  0x68   : > { %v251_v28 = vsub.f32 %v241_v23, %v249_v26  ;;  %v252_v29 = vmul.f32 %v250_v27, %v234_v2 }
  0x6a   : > { %v253_v30 = vmul.f32 %v251_v28, %v235_v3  ;;  %v254_v31 = vadd.f32 %v252_v29, %v248_v25 }
  0x6c   : > { %v255_v32 = vadd.f32 %v253_v30, %v249_v26  ;;  %v256_v33 = vsub.f32 0.0, %v254_v31 }
  0x6e   : > { %v257_v34 = vsub.f32 0.0, %v255_v32 }
  0x70   : > { %v280_v35 = vadd.f32 %v257_v34, %v256_v33 }
  0x72   : > { %422 = vst [vmem:[%s219_s21 + $0x18] sm:$0xff] %v280_v35 }
  0x73   : > { %584 = shalt.err (!%p581_p11)
}
  0x74   : > { %s585_s27 = scalar_lea.hbm %s867_s3, 512  ;;  %s589_s5 = scalar_lea.hbm %s920_s2, 1024 }
  0x75   : > { %p586_p1 = scmp.ne.s32.totalorder %s867_s3, %s585_s27  ;;  %p590_p5 = scmp.lt.u32.totalorder %s867_s3, %s920_s2 }
  0x76   : > { %p591_p4 = scmp.lt.u32.totalorder %s589_s5, %s585_s27  ;;  %p593_p0 = scmp.lt.u32.totalorder %s585_s27, %s867_s3 }
  0x77   : > { %p587_p6 = pnand %p586_p1, %p931_p3 }
  0x78   : > { %p592_p8 = por %p591_p4, %p590_p5 }
  0x79   : > { %p588_p2 = pneg %p587_p6 }
  0x7a   : > { %p594_p12 = por %p593_p0, %p592_p8 }
  0x7c   : > { %p595_p13 = pnand %p594_p12, %p588_p2 }
  0x7e   : > { %598 = shalt.err (!%p595_p13)
}
  0x7f   : > { %s664_s8 = smov 128   ;;  %s665_s21 = smov 8  }
  0x80   : > { %435 = dma.vmem_to_hbm [thread:$0]  (%p931_p3), %s869_s19, 512, %s867_s3, %s284_s15, %s664_s8, %s664_s8, %s665_s21  }
  0x81 PF: > { %s312_s18 = sand.u32 1, %s637_s9   ;;  %p932_p7 = scmp.ne.s32.totalorder %s926_s24, 0 }
  0x82   : > { %p933_p10 = scmp.ge.s32.totalorder %s657_s14, 2  ;;  %s313_s28 = scalar_lea.sflag [#allocation4], %s312_s18 }
  0x84   : > { %p445_p9 = pnand %p933_p10, %p932_p7 }
  0x86   : > { %632 = dma.done.wait (!%p445_p9), %s313_s28, 512  }
  0x87   : > { %634 = vsyncadd (!%p445_p9), %s313_s28, 4294966784  ;;  %s21_s14 = sadd.s32 1, %s657_s14   ;;  %s934_s9 = smov %s641_s10 }
  0x88   : > { %p18_p11 = scmp.ge.s32.totalorder %s21_s14, 4   ;;  %s935_s10 = smov %s645_s11 }
  0x89   : > { %s936_s11 = smov %s737_s23  ;;  %s937_s12 = smov %s653_s13 }
  0x8a   : > { %s938_s13 = smov %s940_s17  ;;  %20 = sbr.rel (!%p18_p11) target bundleno = 8 (0x8), region = 93 }
  0x91   :  { %318 = vsyncpa [#allocation3], 1 }
  0x92   :  { %320 = vsyncpa [#allocation3 + $0x1], 1 }
  0x93   :  { %321 = vsyncpa [#allocation6], 1 }
  0x94   :  { %323 = vsyncpa [#allocation6 + $0x1], 1 }
  0x95   :  { %324 = vsyncpa [#allocation4], 1 }
  0x96   :  { %326 = vsyncpa [#allocation4 + $0x1], 1 }

</bundles_post_ra>
